<compile_context>
chip_gen: v7x
topology: tpu7x:2x2x1
jax: 0.10.0
libtpu: 0.0.40
codegen_flags: <defaults>
</compile_context>

<pallas_src>
import functools

import jax
import jax.numpy as jnp
from jax.experimental import pallas as pl
from jax.experimental.pallas import tpu as pltpu


def _round_up(x, m):
    return (x + m - 1) // m * m


def _low_rank_linear_kernel(x_ref, vt_ref, sk_ref, ukt_ref, b_ref, o_ref,
                            t_acc, *, tk, vt_resident):
    """Grid = (batch tiles, in_features tiles); in_features (k) is the reduction."""
    k = pl.program_id(1)

    @pl.when(k == 0)
    def _():
        t_acc[...] = jnp.zeros_like(t_acc)

    if vt_resident:
        # Vhk^T lives fully in VMEM; slice out the current reduction chunk.
        start = pl.multiple_of(k * tk, tk)
        v = vt_ref[pl.ds(start, tk), :]                         # (tk, rank)
    else:
        v = vt_ref[...]                                         # (tk, rank)

    # Partial rank-space projection: t += x_tile @ (Vhk^T)_tile.
    # bf16 inputs, f32 accumulation; canonical ((1,),(0,)) contraction so the
    # MXU sees a native matmul (no transpose / relayout per k step).
    t_acc[...] += jnp.dot(x_ref[...], v, preferred_element_type=jnp.float32)

    @pl.when(k == pl.num_programs(1) - 1)
    def _():
        # Keep the accumulator in f32 through the finalize (never downcast).
        t = t_acc[...] * sk_ref[...]                            # (tm, rank), f32
        y = jnp.dot(t, ukt_ref[...],
                    preferred_element_type=jnp.float32)         # (tm, out_p)
        o_ref[...] = (y + b_ref[...]).astype(o_ref.dtype)


def _vmem_budget_bytes():
    """Generation-aware VMEM budget (v7x: 64 MiB/TC, v5e/v6e: 128 MiB)."""
    try:
        cap = pltpu.get_tpu_info().vmem_capacity_bytes
    except Exception:
        cap = 64 * 1024 * 1024              # conservative: assume v7x-sized VMEM
    return int(cap * 0.75)                  # headroom for compiler scratch


def _plan_tiles(batch, in_f, out_f, rank, cbytes, obytes, vmem_limit,
                tm_target, tk_target):
    """Pick (tm, tk), padded shapes and Vhk^T residency under the VMEM budget."""
    out_p = _round_up(out_f, 128)           # lane-dense output / Uk^T columns
    in128 = _round_up(in_f, 128)

    # Batch tile: large, but keep >= 2 tiles so the "parallel" axis can shard
    # across v7x's two TensorCores (v5e/v6e have 1 TC, unaffected).
    tm = min(tm_target, _round_up(batch, 8))
    if batch > 8 and _round_up(batch, tm) // tm < 2:
        tm = max(8, _round_up(-(-batch // 2), 8))

    tk = min(_round_up(tk_target, 128), in128)
    vt_res = True

    def usage(tm_, tk_, vt_res_):
        in_p_ = _round_up(in_f, tk_)
        u = 2 * tm_ * tk_ * cbytes                            # x (double buffered)
        u += (in_p_ if vt_res_ else 2 * tk_) * rank * cbytes  # Vhk^T
        u += 2 * tm_ * out_p * obytes                         # output tile
        u += 2 * (rank * out_p + out_p + rank) * 4            # Uk^T, bias, Sk (f32)
        u += tm_ * rank * 4                                   # t_acc scratch
        return u

    while usage(tm, tk, vt_res) > vmem_limit:
        if tk > 128:
            tk = max(128, _round_up(tk // 2, 128))   # shrink reduction tile first
        elif vt_res:
            vt_res = False                           # give up Vhk^T residency
        elif tm > 8:
            tm = max(8, _round_up(tm // 2, 8))
        else:
            break

    batch_p = _round_up(batch, tm)
    in_p = _round_up(in_f, tk)
    return tm, batch_p, tk, in_p, out_p, vt_res


def low_rank_linear(x, Uk, Sk, Vhk, bias, *, compute_dtype=jnp.bfloat16,
                    tm_target=512, tk_target=2048):
    """Forward of LowRankLinear: x (..., in_features) -> (..., out_features)."""
    in_features = x.shape[-1]
    out_features, rank = Uk.shape
    assert Vhk.shape == (rank, in_features)
    assert Sk.shape == (rank,)
    assert bias.shape == (out_features,)

    lead_shape = x.shape[:-1]
    x2 = x.reshape(-1, in_features)
    batch = x2.shape[0]
    out_dtype = x2.dtype
    if compute_dtype is None:
        compute_dtype = out_dtype

    vmem_limit = _vmem_budget_bytes()
    tm, batch_p, tk, in_p, out_p, vt_resident = _plan_tiles(
        batch, in_features, out_features, rank,
        jnp.dtype(compute_dtype).itemsize, jnp.dtype(out_dtype).itemsize,
        vmem_limit, tm_target, tk_target)

    # Wrapper-side layout prep (one-time, cheap next to the x stream): pad to
    # tile multiples with zeros, pre-transpose so both kernel GEMMs contract
    # ((1,),(0,)), stream x / Vhk^T in compute_dtype (bf16 by default).
    x_p = jnp.pad(x2, ((0, batch_p - batch),
                       (0, in_p - in_features))).astype(compute_dtype)
    vt_p = jnp.pad(Vhk.T.astype(compute_dtype),
                   ((0, in_p - in_features), (0, 0)))               # (in_p, rank)
    ukt_p = jnp.pad(Uk.astype(jnp.float32),
                    ((0, out_p - out_features), (0, 0))).T          # (rank, out_p)
    sk2 = Sk.astype(jnp.float32).reshape(1, rank)
    b2 = jnp.pad(bias.astype(jnp.float32),
                 (0, out_p - out_features)).reshape(1, out_p)

    grid = (batch_p // tm, in_p // tk)
    kernel = functools.partial(_low_rank_linear_kernel, tk=tk,
                               vt_resident=vt_resident)

    def build(single_buffer_constants):
        # Constant-index operands never change block index -> one buffer is
        # enough; the default double buffer would only waste VMEM headroom.
        ckw = (dict(pipeline_mode=pl.Buffered(1))
               if single_buffer_constants else {})
        if vt_resident:
            vt_spec = pl.BlockSpec((in_p, rank), lambda i, k: (0, 0), **ckw)
        else:
            # Vhk^T too large to keep resident: accept per-batch-tile re-stream.
            vt_spec = pl.BlockSpec((tk, rank), lambda i, k: (k, 0))
        return pl.pallas_call(
            kernel,
            out_shape=jax.ShapeDtypeStruct((batch_p, out_p), out_dtype),
            grid_spec=pltpu.PrefetchScalarGridSpec(
                num_scalar_prefetch=0,
                grid=grid,
                in_specs=[
                    # x: streamed (tm, tk) tiles in compute_dtype.
                    pl.BlockSpec((tm, tk), lambda i, k: (i, k)),
                    vt_spec,
                    # Sk, Uk^T, bias: tiny, resident, f32.
                    pl.BlockSpec((1, rank), lambda i, k: (0, 0), **ckw),
                    pl.BlockSpec((rank, out_p), lambda i, k: (0, 0), **ckw),
                    pl.BlockSpec((1, out_p), lambda i, k: (0, 0), **ckw),
                ],
                # Output block index constant along k: resident across the
                # reduction, written back once per batch tile (lane-dense).
                out_specs=pl.BlockSpec((tm, out_p), lambda i, k: (i, 0)),
                scratch_shapes=[pltpu.VMEM((tm, rank), jnp.float32)],
            ),
            compiler_params=pltpu.CompilerParams(
                dimension_semantics=("parallel", "arbitrary"),
                vmem_limit_bytes=vmem_limit,
            ),
        )

    args = (x_p, vt_p, sk2, ukt_p, b2)
    try:
        y_p = build(True)(*args)
    except Exception:
        # pipeline_mode=pl.Buffered(1) unsupported on this jax build; fall back
        # to default double-buffered constants (slightly more VMEM, same math).
        y_p = build(False)(*args)

    y = y_p[:batch, :out_features]
    return y.reshape(*lead_shape, out_features)


def _orthogonal(key, rows, cols, dtype=jnp.float32):
    """Deterministic orthogonal init (mimics nn.init.orthogonal_)."""
    n = max(rows, cols)
    a = jax.random.normal(key, (n, n), dtype=jnp.float32)
    q, r = jnp.linalg.qr(a)
    q = q * jnp.sign(jnp.diag(r))[None, :]
    return q[:rows, :cols].astype(dtype)


def _reference(x, Uk, Sk, Vhk, bias, compute_dtype=None):
    """PyTorch-equivalent forward; optionally cast-matches the bf16 stream."""
    if compute_dtype is not None:
        x = x.astype(compute_dtype).astype(jnp.float32)
        Vhk = Vhk.astype(compute_dtype).astype(jnp.float32)
    hi = jax.lax.Precision.HIGHEST
    w = jnp.matmul(Uk * Sk[None, :], Vhk, precision=hi)
    return jnp.matmul(x, w.T, precision=hi) + bias[None, :]


if __name__ == "__main__":
    key = jax.random.PRNGKey(0)

    # ---- Test 1: module-sized small shapes --------------------------------
    in_f, out_f, rank, batch = 32, 16, 8, 8
    k_uk, k_vhk, k_sk, k_b, k_x = jax.random.split(key, 5)
    Uk = _orthogonal(k_uk, out_f, rank)                              # (out, rank)
    Vhk = _orthogonal(k_vhk, rank, in_f)                             # (rank, in)
    Sk = 1.0 + jax.random.normal(k_sk, (rank,)) / rank ** 0.5        # (rank,)
    bound = 1.0 / in_f ** 0.5
    bias = jax.random.uniform(k_b, (out_f,), minval=-bound, maxval=bound)
    x = jax.random.normal(k_x, (batch, in_f), dtype=jnp.float32)

    # Exact f32 path (strict tolerance).
    y32 = jax.block_until_ready(
        low_rank_linear(x, Uk, Sk, Vhk, bias, compute_dtype=jnp.float32))
    assert y32.shape == (batch, out_f)
    assert jnp.allclose(y32, _reference(x, Uk, Sk, Vhk, bias),
                        atol=1e-5, rtol=1e-5), "f32 path mismatch"

    # Default bf16-streamed path (f32 accumulation) vs cast-matched reference.
    ybf = jax.block_until_ready(low_rank_linear(x, Uk, Sk, Vhk, bias))
    assert jnp.allclose(ybf,
                        _reference(x, Uk, Sk, Vhk, bias,
                                   compute_dtype=jnp.bfloat16),
                        atol=1e-2, rtol=1e-2), "bf16 path mismatch"

    # ---- Test 2: ragged shapes exercising padding + multi-tile grid -------
    in_f2, out_f2, rank2, batch2 = 1000, 272, 24, 90
    k1, k2, k3, k4, k5 = jax.random.split(jax.random.PRNGKey(1), 5)
    Uk2 = jax.random.normal(k1, (out_f2, rank2)) / rank2 ** 0.5
    Vhk2 = jax.random.normal(k2, (rank2, in_f2)) / in_f2 ** 0.5
    Sk2 = 1.0 + jax.random.normal(k3, (rank2,)) / rank2 ** 0.5
    bias2 = jax.random.uniform(k4, (out_f2,), minval=-0.03, maxval=0.03)
    x2 = jax.random.normal(k5, (batch2, in_f2), dtype=jnp.float32)

    y2 = jax.block_until_ready(
        low_rank_linear(x2, Uk2, Sk2, Vhk2, bias2,
                        tm_target=32, tk_target=256))   # force a multi-tile grid
    assert y2.shape == (batch2, out_f2)
    assert jnp.allclose(y2,
                        _reference(x2, Uk2, Sk2, Vhk2, bias2,
                                   compute_dtype=jnp.bfloat16),
                        atol=1e-2, rtol=1e-2), "padded/tiled path mismatch"

    print("KERNEL_OK")
</pallas_src>

<mosaic_0001>
module attributes {stable_mosaic.version = 11 : i64} {
  func.func @_low_rank_linear_kernel(%arg0: i32, %arg1: i32, %arg2: memref<8x128xf32, #tpu.memory_space<vmem>>, %arg3: memref<128x8xf32, #tpu.memory_space<vmem>>, %arg4: memref<1x8xf32, #tpu.memory_space<vmem>>, %arg5: memref<8x128xf32, #tpu.memory_space<vmem>>, %arg6: memref<1x128xf32, #tpu.memory_space<vmem>>, %arg7: memref<8x128xf32, #tpu.memory_space<vmem>>, %arg8: memref<8x8xf32, #tpu.memory_space<vmem>>) attributes {dimension_semantics = [#tpu.dimension_semantics<parallel>, #tpu.dimension_semantics<arbitrary>], iteration_bounds = array<i64: 1, 1>, scalar_prefetch = 0 : i64, scratch_operands = 1 : i64, tpu.core_type = #tpu.core_type<tc>, window_params = [{transform_indices = @transform_0, window_bounds = array<i64: 8, 128>}, {pipeline_mode = #tpu.pipeline_mode<synchronous>, transform_indices = @transform_1, window_bounds = array<i64: 128, 8>}, {pipeline_mode = #tpu.pipeline_mode<synchronous>, transform_indices = @transform_2, window_bounds = array<i64: 1, 8>}, {pipeline_mode = #tpu.pipeline_mode<synchronous>, transform_indices = @transform_3, window_bounds = array<i64: 8, 128>}, {pipeline_mode = #tpu.pipeline_mode<synchronous>, transform_indices = @transform_4, window_bounds = array<i64: 1, 128>}, {transform_indices = @transform_5, window_bounds = array<i64: 8, 128>}]} {
    %c0_i32 = arith.constant 0 : i32
    %0 = arith.cmpi eq, %arg1, %c0_i32 : i32
    %1 = arith.extui %0 : i1 to i32
    %c0_i32_0 = arith.constant 0 : i32
    %2 = arith.cmpi ne, %1, %c0_i32_0 : i32
    scf.if %2 {
      %cst_9 = arith.constant 0.000000e+00 : f32
      %15 = vector.broadcast %cst_9 : f32 to vector<8x8xf32>
      %c0_10 = arith.constant 0 : index
      %c0_11 = arith.constant 0 : index
      %16 = vector.load %arg8[%c0_10, %c0_11] : memref<8x8xf32, #tpu.memory_space<vmem>>, vector<8x8xf32>
      tpu.vector_store %arg8[%c0_10, %c0_11], %15 {strides = array<i32>} : memref<8x8xf32, #tpu.memory_space<vmem>>, vector<8x8xf32>,
    } else {
    }
    %c128_i32 = arith.constant 128 : i32
    %3 = arith.muli %arg1, %c128_i32 : i32
    %4 = tpu.assume_multiple %3, 128 : i32
    %5 = arith.index_cast %4 : i32 to index
    %c0 = arith.constant 0 : index
    %6 = vector.load %arg3[%5, %c0] : memref<128x8xf32, #tpu.memory_space<vmem>>, vector<128x8xf32>
    %c0_1 = arith.constant 0 : index
    %c0_2 = arith.constant 0 : index
    %7 = vector.load %arg8[%c0_1, %c0_2] : memref<8x8xf32, #tpu.memory_space<vmem>>, vector<8x8xf32>
    %c0_3 = arith.constant 0 : index
    %c0_4 = arith.constant 0 : index
    %8 = vector.load %arg2[%c0_3, %c0_4] : memref<8x128xf32, #tpu.memory_space<vmem>>, vector<8x128xf32>
    %cst = arith.constant dense<0.000000e+00> : vector<8x8xf32>
    %9 = tpu.matmul %8, %6, %cst {dimension_numbers = #tpu.dot_dimension_numbers<[1], [0], [0], [1], [0, 0, 1, 1], [], []>} : vector<8x128xf32>, vector<128x8xf32>, vector<8x8xf32> -> vector<8x8xf32>
    %10 = arith.addf %7, %9 : vector<8x8xf32>
    %c0_5 = arith.constant 0 : index
    %c0_6 = arith.constant 0 : index
    %11 = vector.load %arg8[%c0_5, %c0_6] : memref<8x8xf32, #tpu.memory_space<vmem>>, vector<8x8xf32>
    tpu.vector_store %arg8[%c0_5, %c0_6], %10 {strides = array<i32>} : memref<8x8xf32, #tpu.memory_space<vmem>>, vector<8x8xf32>,
    %c0_i32_7 = arith.constant 0 : i32
    %12 = arith.cmpi eq, %arg1, %c0_i32_7 : i32
    %13 = arith.extui %12 : i1 to i32
    %c0_i32_8 = arith.constant 0 : i32
    %14 = arith.cmpi ne, %13, %c0_i32_8 : i32
    scf.if %14 {
      %c0_9 = arith.constant 0 : index
      %c0_10 = arith.constant 0 : index
      %15 = vector.load %arg8[%c0_9, %c0_10] : memref<8x8xf32, #tpu.memory_space<vmem>>, vector<8x8xf32>
      %c0_11 = arith.constant 0 : index
      %c0_12 = arith.constant 0 : index
      %16 = vector.load %arg4[%c0_11, %c0_12] : memref<1x8xf32, #tpu.memory_space<vmem>>, vector<1x8xf32>
      %17 = vector.broadcast %16 : vector<1x8xf32> to vector<8x8xf32>
      %18 = arith.mulf %15, %17 : vector<8x8xf32>
      %c0_13 = arith.constant 0 : index
      %c0_14 = arith.constant 0 : index
      %19 = vector.load %arg5[%c0_13, %c0_14] : memref<8x128xf32, #tpu.memory_space<vmem>>, vector<8x128xf32>
      %cst_15 = arith.constant dense<0.000000e+00> : vector<8x128xf32>
      %20 = tpu.matmul %18, %19, %cst_15 {dimension_numbers = #tpu.dot_dimension_numbers<[1], [0], [0], [1], [0, 0, 1, 1], [], []>} : vector<8x8xf32>, vector<8x128xf32>, vector<8x128xf32> -> vector<8x128xf32>
      %c0_16 = arith.constant 0 : index
      %c0_17 = arith.constant 0 : index
      %21 = vector.load %arg6[%c0_16, %c0_17] : memref<1x128xf32, #tpu.memory_space<vmem>>, vector<1x128xf32>
      %22 = vector.broadcast %21 : vector<1x128xf32> to vector<8x128xf32>
      %23 = arith.addf %20, %22 : vector<8x128xf32>
      %c0_18 = arith.constant 0 : index
      %c0_19 = arith.constant 0 : index
      %24 = vector.load %arg7[%c0_18, %c0_19] : memref<8x128xf32, #tpu.memory_space<vmem>>, vector<8x128xf32>
      tpu.vector_store %arg7[%c0_18, %c0_19], %23 {strides = array<i32>} : memref<8x128xf32, #tpu.memory_space<vmem>>, vector<8x128xf32>,
    } else {
    }
    return
  }
  func.func @transform_0(%arg0: i32, %arg1: i32) -> (i32, i32) {
    %c0_i32 = arith.constant 0 : i32
    return %arg0, %arg1 : i32, i32
  }
  func.func @transform_1(%arg0: i32, %arg1: i32) -> (i32, i32) {
    %c0_i32 = arith.constant 0 : i32
    %c0_i32_0 = arith.constant 0 : i32
    %c0_i32_1 = arith.constant 0 : i32
    return %c0_i32, %c0_i32_0 : i32, i32
  }
  func.func @transform_2(%arg0: i32, %arg1: i32) -> (i32, i32) {
    %c0_i32 = arith.constant 0 : i32
    %c0_i32_0 = arith.constant 0 : i32
    %c0_i32_1 = arith.constant 0 : i32
    return %c0_i32, %c0_i32_0 : i32, i32
  }
  func.func @transform_3(%arg0: i32, %arg1: i32) -> (i32, i32) {
    %c0_i32 = arith.constant 0 : i32
    %c0_i32_0 = arith.constant 0 : i32
    %c0_i32_1 = arith.constant 0 : i32
    return %c0_i32, %c0_i32_0 : i32, i32
  }
  func.func @transform_4(%arg0: i32, %arg1: i32) -> (i32, i32) {
    %c0_i32 = arith.constant 0 : i32
    %c0_i32_0 = arith.constant 0 : i32
    %c0_i32_1 = arith.constant 0 : i32
    return %c0_i32, %c0_i32_0 : i32, i32
  }
  func.func @transform_5(%arg0: i32, %arg1: i32) -> (i32, i32) {
    %c0_i32 = arith.constant 0 : i32
    %c0_i32_0 = arith.constant 0 : i32
    return %arg0, %c0_i32 : i32, i32
  }
}

module attributes {stable_mosaic.version = 11 : i64} {
  func.func @_low_rank_linear_kernel(%arg0: i32, %arg1: i32, %arg2: memref<8x128xf32, #tpu.memory_space<vmem>>, %arg3: memref<128x8xf32, #tpu.memory_space<vmem>>, %arg4: memref<1x8xf32, #tpu.memory_space<vmem>>, %arg5: memref<8x128xf32, #tpu.memory_space<vmem>>, %arg6: memref<1x128xf32, #tpu.memory_space<vmem>>, %arg7: memref<8x128xf32, #tpu.memory_space<vmem>>, %arg8: memref<8x8xf32, #tpu.memory_space<vmem>>) attributes {dimension_semantics = [#tpu.dimension_semantics<parallel>, #tpu.dimension_semantics<arbitrary>], iteration_bounds = array<i64: 1, 1>, scalar_prefetch = 0 : i64, scratch_operands = 1 : i64, tpu.core_type = #tpu.core_type<tc>, window_params = [{transform_indices = @transform_0, window_bounds = array<i64: 8, 128>}, {pipeline_mode = #tpu.pipeline_mode<synchronous>, transform_indices = @transform_1, window_bounds = array<i64: 128, 8>}, {pipeline_mode = #tpu.pipeline_mode<synchronous>, transform_indices = @transform_2, window_bounds = array<i64: 1, 8>}, {pipeline_mode = #tpu.pipeline_mode<synchronous>, transform_indices = @transform_3, window_bounds = array<i64: 8, 128>}, {pipeline_mode = #tpu.pipeline_mode<synchronous>, transform_indices = @transform_4, window_bounds = array<i64: 1, 128>}, {transform_indices = @transform_5, window_bounds = array<i64: 8, 128>}]} {
    %c0_i32 = arith.constant 0 : i32
    %0 = arith.cmpi eq, %arg1, %c0_i32 : i32
    %1 = arith.extui %0 : i1 to i32
    %c0_i32_0 = arith.constant 0 : i32
    %2 = arith.cmpi ne, %1, %c0_i32_0 : i32
    scf.if %2 {
      %cst_9 = arith.constant 0.000000e+00 : f32
      %15 = vector.broadcast %cst_9 : f32 to vector<8x8xf32>
      %c0_10 = arith.constant 0 : index
      %c0_11 = arith.constant 0 : index
      %16 = vector.load %arg8[%c0_10, %c0_11] : memref<8x8xf32, #tpu.memory_space<vmem>>, vector<8x8xf32>
      tpu.vector_store %arg8[%c0_10, %c0_11], %15 {strides = array<i32>} : memref<8x8xf32, #tpu.memory_space<vmem>>, vector<8x8xf32>,
    } else {
    }
    %c128_i32 = arith.constant 128 : i32
    %3 = arith.muli %arg1, %c128_i32 : i32
    %4 = tpu.assume_multiple %3, 128 : i32
    %5 = arith.index_cast %4 : i32 to index
    %c0 = arith.constant 0 : index
    %6 = vector.load %arg3[%5, %c0] : memref<128x8xf32, #tpu.memory_space<vmem>>, vector<128x8xf32>
    %c0_1 = arith.constant 0 : index
    %c0_2 = arith.constant 0 : index
    %7 = vector.load %arg8[%c0_1, %c0_2] : memref<8x8xf32, #tpu.memory_space<vmem>>, vector<8x8xf32>
    %c0_3 = arith.constant 0 : index
    %c0_4 = arith.constant 0 : index
    %8 = vector.load %arg2[%c0_3, %c0_4] : memref<8x128xf32, #tpu.memory_space<vmem>>, vector<8x128xf32>
    %cst = arith.constant dense<0.000000e+00> : vector<8x8xf32>
    %9 = tpu.matmul %8, %6, %cst {dimension_numbers = #tpu.dot_dimension_numbers<[1], [0], [0], [1], [0, 0, 1, 1], [], []>} : vector<8x128xf32>, vector<128x8xf32>, vector<8x8xf32> -> vector<8x8xf32>
    %10 = arith.addf %7, %9 : vector<8x8xf32>
    %c0_5 = arith.constant 0 : index
    %c0_6 = arith.constant 0 : index
    %11 = vector.load %arg8[%c0_5, %c0_6] : memref<8x8xf32, #tpu.memory_space<vmem>>, vector<8x8xf32>
    tpu.vector_store %arg8[%c0_5, %c0_6], %10 {strides = array<i32>} : memref<8x8xf32, #tpu.memory_space<vmem>>, vector<8x8xf32>,
    %c0_i32_7 = arith.constant 0 : i32
    %12 = arith.cmpi eq, %arg1, %c0_i32_7 : i32
    %13 = arith.extui %12 : i1 to i32
    %c0_i32_8 = arith.constant 0 : i32
    %14 = arith.cmpi ne, %13, %c0_i32_8 : i32
    scf.if %14 {
      %c0_9 = arith.constant 0 : index
      %c0_10 = arith.constant 0 : index
      %15 = vector.load %arg8[%c0_9, %c0_10] : memref<8x8xf32, #tpu.memory_space<vmem>>, vector<8x8xf32>
      %c0_11 = arith.constant 0 : index
      %c0_12 = arith.constant 0 : index
      %16 = vector.load %arg4[%c0_11, %c0_12] : memref<1x8xf32, #tpu.memory_space<vmem>>, vector<1x8xf32>
      %17 = vector.broadcast %16 : vector<1x8xf32> to vector<8x8xf32>
      %18 = arith.mulf %15, %17 : vector<8x8xf32>
      %c0_13 = arith.constant 0 : index
      %c0_14 = arith.constant 0 : index
      %19 = vector.load %arg5[%c0_13, %c0_14] : memref<8x128xf32, #tpu.memory_space<vmem>>, vector<8x128xf32>
      %cst_15 = arith.constant dense<0.000000e+00> : vector<8x128xf32>
      %20 = tpu.matmul %18, %19, %cst_15 {dimension_numbers = #tpu.dot_dimension_numbers<[1], [0], [0], [1], [0, 0, 1, 1], [], []>} : vector<8x8xf32>, vector<8x128xf32>, vector<8x128xf32> -> vector<8x128xf32>
      %c0_16 = arith.constant 0 : index
      %c0_17 = arith.constant 0 : index
      %21 = vector.load %arg6[%c0_16, %c0_17] : memref<1x128xf32, #tpu.memory_space<vmem>>, vector<1x128xf32>
      %22 = vector.broadcast %21 : vector<1x128xf32> to vector<8x128xf32>
      %23 = arith.addf %20, %22 : vector<8x128xf32>
      %c0_18 = arith.constant 0 : index
      %c0_19 = arith.constant 0 : index
      %24 = vector.load %arg7[%c0_18, %c0_19] : memref<8x128xf32, #tpu.memory_space<vmem>>, vector<8x128xf32>
      tpu.vector_store %arg7[%c0_18, %c0_19], %23 {strides = array<i32>} : memref<8x128xf32, #tpu.memory_space<vmem>>, vector<8x128xf32>,
    } else {
    }
    return
  }
  func.func @transform_0(%arg0: i32, %arg1: i32) -> (i32, i32) {
    %c0_i32 = arith.constant 0 : i32
    return %arg0, %arg1 : i32, i32
  }
  func.func @transform_1(%arg0: i32, %arg1: i32) -> (i32, i32) {
    %c0_i32 = arith.constant 0 : i32
    %c0_i32_0 = arith.constant 0 : i32
    %c0_i32_1 = arith.constant 0 : i32
    return %c0_i32, %c0_i32_0 : i32, i32
  }
  func.func @transform_2(%arg0: i32, %arg1: i32) -> (i32, i32) {
    %c0_i32 = arith.constant 0 : i32
    %c0_i32_0 = arith.constant 0 : i32
    %c0_i32_1 = arith.constant 0 : i32
    return %c0_i32, %c0_i32_0 : i32, i32
  }
  func.func @transform_3(%arg0: i32, %arg1: i32) -> (i32, i32) {
    %c0_i32 = arith.constant 0 : i32
    %c0_i32_0 = arith.constant 0 : i32
    %c0_i32_1 = arith.constant 0 : i32
    return %c0_i32, %c0_i32_0 : i32, i32
  }
  func.func @transform_4(%arg0: i32, %arg1: i32) -> (i32, i32) {
    %c0_i32 = arith.constant 0 : i32
    %c0_i32_0 = arith.constant 0 : i32
    %c0_i32_1 = arith.constant 0 : i32
    return %c0_i32, %c0_i32_0 : i32, i32
  }
  func.func @transform_5(%arg0: i32, %arg1: i32) -> (i32, i32) {
    %c0_i32 = arith.constant 0 : i32
    %c0_i32_0 = arith.constant 0 : i32
    return %arg0, %c0_i32 : i32, i32
  }
}

</mosaic_0001>

<bundles_post_ra>
// kernel: tpu_custom_call.1
= control target key start
LH: loop header
LB: loop body
LE: loop exit
PB: predicated region body
PF: predicated region fallthrough
CT: control target
= control target key end

     0   :  { %v342_v3 = vmov 0.0|0.0   ;;  %vm343_vm0 = vmmov 0   ;;  %v344_v6 = vmov 0.0   ;;  %vm25_vm1 = vcmask 64512   ;;  %s451_s0 = inlined_call_operand.vmem [shape: f32[8,128], index: 0, kind: input, shape index: {}]   ;;  %s452_s1 = inlined_call_operand.vmem [shape: f32[128,8], index: 1, kind: input, shape index: {}]   ;;  %s453_s2 = inlined_call_operand.vmem [shape: f32[1,8], index: 2, kind: input, shape index: {}]   ;;  %s454_s3 = inlined_call_operand.vmem [shape: f32[8,128], index: 3, kind: input, shape index: {}]   ;;  %s455_s4 = inlined_call_operand.vmem [shape: f32[1,128], index: 4, kind: input, shape index: {}]   ;;  %s456_s5 = inlined_call_operand.hbm [shape: f32[8,128], index: 5, kind: output, shape index: {}]  }
   0x1   :  { %v29_v0 = vld [vmem:[%s452_s1] sm:$0xff]  ;;  %v30_v1 = vld [vmem:[%s452_s1 + $0x8] sm:$0xff]  ;;  %v31_v2 = vld [vmem:[%s452_s1 + $0x10] sm:$0xff]  ;;  %290 = vmatprep.subr.bf16.mxu0 %v342_v3  ;;  %282 = vmatprep.mubr.msk.f32.mxu0 %vm343_vm0, %v344_v6  ;;  %26 = vst.msk [vmem:[#allocation2] sm:$0xff] %vm25_vm1, %v344_v6 }
   0x2   :  { %v291_v4 = vpack.c.bf16 %v30_v1, %v29_v0  ;;  %v32_v5 = vld [vmem:[%s452_s1 + $0x18] sm:$0xff]  ;;  %285 = vmatprep.subr.mxu1 %v344_v6  ;;  %287 = vmatprep.mubr.msk.f32.mxu1 %vm343_vm0, %v344_v6  ;;  %v33_v8 = vld [vmem:[%s452_s1 + $0x20] sm:$0xff]  ;;  %v34_v9 = vld [vmem:[%s452_s1 + $0x28] sm:$0xff] }
   0x3   :  { %v294_v7 = vpack.c.bf16 %v32_v5, %v31_v2 }
   0x4   :  { %292 = vmatpush3.bf16.msra.mxu0 %v291_v4 }
   0x5   :  { %293 = vmatprep.subr.bf16.mxu0 %v342_v3 }
   0x6   :  { %10 = vsyncpa [#allocation4], 0  ;;  %v297_v10 = vpack.c.bf16 %v34_v9, %v33_v8  ;;  %v35_v11 = vld [vmem:[%s452_s1 + $0x30] sm:$0xff]  ;;  %v36_v12 = vld [vmem:[%s452_s1 + $0x38] sm:$0xff] }
   0x7   :  { %v300_v13 = vpack.c.bf16 %v36_v12, %v35_v11  ;;  %v37_v14 = vld [vmem:[%s452_s1 + $0x40] sm:$0xff]  ;;  %v38_v15 = vld [vmem:[%s452_s1 + $0x48] sm:$0xff]  ;;  %v39_v17 = vld [vmem:[%s452_s1 + $0x50] sm:$0xff] }
   0x8   :  { %295 = vmatpush3.bf16.msra.mxu0 %v294_v7  ;;  %v303_v16 = vpack.c.bf16 %v38_v15, %v37_v14  ;;  %v40_v18 = vld [vmem:[%s452_s1 + $0x58] sm:$0xff]  ;;  %v41_v20 = vld [vmem:[%s452_s1 + $0x60] sm:$0xff]  ;;  %v42_v21 = vld [vmem:[%s452_s1 + $0x68] sm:$0xff] }
   0x9   :  { %296 = vmatprep.subr.bf16.mxu0 %v342_v3  ;;  %v306_v19 = vpack.c.bf16 %v40_v18, %v39_v17  ;;  %v309_v22 = vpack.c.bf16 %v42_v21, %v41_v20  ;;  %v43_v23 = vld [vmem:[%s452_s1 + $0x70] sm:$0xff]  ;;  %v44_v24 = vld [vmem:[%s452_s1 + $0x78] sm:$0xff]  ;;  %v46_v26 = vld [vmem:[%s451_s0] sm:$0xff] }
   0xa   :  { %v312_v25 = vpack.c.bf16 %v44_v24, %v43_v23  ;;  %v132_v27 = vld [vmem:[%s454_s3] sm:$0xff]  ;;  %s345_s3 = smov [#allocation3]  }
   0xb   :  { %286 = vmatpush3.msra.mxu1 %v132_v27  ;;  %v45_v28 = vld [vmem:[#allocation2] sm:$0xff]  ;;  %s220_s6 = sshll.u32 %s345_s3, 4  ;;  %s221_s6 = int_to_ptr.vmem [resolvable:$true] %s220_s6 }
   0xc   :  { %298 = vmatpush3.bf16.msra.mxu0 %v297_v10  ;;  %v228_v32 = vld [vmem:[%s453_s2] ss:$0 sm:$0xff]  ;;  %s318_s7 = scalar_lea.vmem %s221_s6, 128  ;;  %p323_p1 = scmp.lt.s32.totalorder %s221_s6, %s221_s6 }
   0xd   :  { %299 = vmatprep.subr.bf16.mxu0 %v342_v3  ;;  %v229_v35 = vld [vmem:[%s455_s4] ss:$0 sm:$0xff]  ;;  %p319_p0 = scmp.ne.s32.totalorder %s221_s6, %s318_s7  ;;  %p324_p2 = scmp.lt.s32.totalorder %s318_s7, %s318_s7 }
   0xf   :  { %p325_p3 = por %p324_p2, %p323_p1 }
  0x10   :  { %301 = vmatpush3.bf16.msra.mxu0 %v300_v13 }
  0x11   :  { %302 = vmatprep.subr.bf16.mxu0 %v342_v3  ;;  %p326_p4 = pnand %p325_p3, %p319_p0 }
  0x14   :  { %304 = vmatpush3.bf16.msra.mxu0 %v303_v16 }
  0x15   :  { %305 = vmatprep.subr.bf16.mxu0 %v342_v3 }
  0x18   :  { %307 = vmatpush3.bf16.msra.mxu0 %v306_v19 }
  0x19   :  { %308 = vmatprep.subr.bf16.mxu0 %v342_v3 }
  0x1c   :  { %310 = vmatpush3.bf16.msra.mxu0 %v309_v22 }
  0x1d   :  { %311 = vmatprep.subr.bf16.mxu0 %v342_v3 }
  0x20   :  { %313 = vmatpush3.bf16.msra.mxu0 %v312_v25 }
  0x23   :  { %283 = vmatmul.mubr.f32.vlgmr.msra.gmra.mrb[0].mxu0 %v46_v26 }
  0xf6   :  { %v113_v29 = vpop.f32.mrb[0].mxu0 }
  0xf7   :  { %v117_v30 = vadd.f32 %v113_v29, %v45_v28  ;;  %v284_v31 = vpop.f32.mrb[1].mxu0 }
  0xf9   :  { %119 = vst.msk [vmem:[#allocation2] sm:$0xff] %vm25_vm1, %v117_v30 }
 0x100   :  { %v123_v33 = vld [vmem:[#allocation2] sm:$0xff] }
 0x101   :  { %v131_v34 = vmul.f32 %v228_v32, %v123_v33 }
 0x103   :  { %288 = vmatmul.mubr.msk.f32.vlgmr.msra.gmra.mrb[0].mxu1 %vm25_vm1, %v131_v34 }
 0x1d6   :  { %v209_v36 = vpop.f32.mrb[0].mxu1 }
 0x1d7   :  { %v210_v37 = vadd.f32 %v229_v35, %v209_v36  ;;  %v289_v38 = vpop.f32.mrb[1].mxu1 }
 0x1d9   :  { %213 = vst [vmem:[#allocation3] sm:$0xff] %v210_v37 }
 0x1da   :  { %329 = shalt.err (!%p326_p4)
}
 0x1db   :  { %s330_s9 = scalar_lea.hbm %s456_s5, 128 }
 0x1dc   :  { %p331_p5 = scmp.ne.s32.totalorder %s456_s5, %s330_s9  ;;  %p334_p6 = scmp.lt.u32.totalorder %s330_s9, %s456_s5 }
 0x1de   :  { %p336_p7 = pnand %p334_p6, %p331_p5 }
 0x1e0   :  { %339 = shalt.err (!%p336_p7)
}
 0x1e1   :  { %223 = dma.vmem_to_hbm [thread:$0]  %s221_s6, 128, %s456_s5, [#allocation4]  }
 0x1e2   :  { %340 = dma.done.wait [#allocation4], 128  }
 0x1e3   :  { %341 = vsyncadd [#allocation4], 4294967168 }
 0x1e4   :  { %227 = vsyncpa [#allocation4], 1 }

// kernel: tpu_custom_call.1
= control target key start
LH: loop header
LB: loop body
LE: loop exit
PB: predicated region body
PF: predicated region fallthrough
CT: control target
= control target key end

     0   :  { %v342_v3 = vmov 0.0|0.0   ;;  %vm343_vm0 = vmmov 0   ;;  %v344_v6 = vmov 0.0   ;;  %vm25_vm1 = vcmask 64512   ;;  %s451_s0 = inlined_call_operand.vmem [shape: f32[8,128], index: 0, kind: input, shape index: {}]   ;;  %s452_s1 = inlined_call_operand.vmem [shape: f32[128,8], index: 1, kind: input, shape index: {}]   ;;  %s453_s2 = inlined_call_operand.vmem [shape: f32[1,8], index: 2, kind: input, shape index: {}]   ;;  %s454_s3 = inlined_call_operand.vmem [shape: f32[8,128], index: 3, kind: input, shape index: {}]   ;;  %s455_s4 = inlined_call_operand.vmem [shape: f32[1,128], index: 4, kind: input, shape index: {}]   ;;  %s456_s5 = inlined_call_operand.hbm [shape: f32[8,128], index: 5, kind: output, shape index: {}]  }
   0x1   :  { %v29_v0 = vld [vmem:[%s452_s1] sm:$0xff]  ;;  %v30_v1 = vld [vmem:[%s452_s1 + $0x8] sm:$0xff]  ;;  %v31_v2 = vld [vmem:[%s452_s1 + $0x10] sm:$0xff]  ;;  %290 = vmatprep.subr.bf16.mxu0 %v342_v3  ;;  %282 = vmatprep.mubr.msk.f32.mxu0 %vm343_vm0, %v344_v6  ;;  %26 = vst.msk [vmem:[#allocation2] sm:$0xff] %vm25_vm1, %v344_v6 }
   0x2   :  { %v291_v4 = vpack.c.bf16 %v30_v1, %v29_v0  ;;  %v32_v5 = vld [vmem:[%s452_s1 + $0x18] sm:$0xff]  ;;  %285 = vmatprep.subr.mxu1 %v344_v6  ;;  %287 = vmatprep.mubr.msk.f32.mxu1 %vm343_vm0, %v344_v6  ;;  %v33_v8 = vld [vmem:[%s452_s1 + $0x20] sm:$0xff]  ;;  %v34_v9 = vld [vmem:[%s452_s1 + $0x28] sm:$0xff] }
   0x3   :  { %v294_v7 = vpack.c.bf16 %v32_v5, %v31_v2 }
   0x4   :  { %292 = vmatpush3.bf16.msra.mxu0 %v291_v4 }
   0x5   :  { %293 = vmatprep.subr.bf16.mxu0 %v342_v3 }
   0x6   :  { %10 = vsyncpa [#allocation4], 0  ;;  %v297_v10 = vpack.c.bf16 %v34_v9, %v33_v8  ;;  %v35_v11 = vld [vmem:[%s452_s1 + $0x30] sm:$0xff]  ;;  %v36_v12 = vld [vmem:[%s452_s1 + $0x38] sm:$0xff] }
   0x7   :  { %v300_v13 = vpack.c.bf16 %v36_v12, %v35_v11  ;;  %v37_v14 = vld [vmem:[%s452_s1 + $0x40] sm:$0xff]  ;;  %v38_v15 = vld [vmem:[%s452_s1 + $0x48] sm:$0xff]  ;;  %v39_v17 = vld [vmem:[%s452_s1 + $0x50] sm:$0xff] }
   0x8   :  { %295 = vmatpush3.bf16.msra.mxu0 %v294_v7  ;;  %v303_v16 = vpack.c.bf16 %v38_v15, %v37_v14  ;;  %v40_v18 = vld [vmem:[%s452_s1 + $0x58] sm:$0xff]  ;;  %v41_v20 = vld [vmem:[%s452_s1 + $0x60] sm:$0xff]  ;;  %v42_v21 = vld [vmem:[%s452_s1 + $0x68] sm:$0xff] }
   0x9   :  { %296 = vmatprep.subr.bf16.mxu0 %v342_v3  ;;  %v306_v19 = vpack.c.bf16 %v40_v18, %v39_v17  ;;  %v309_v22 = vpack.c.bf16 %v42_v21, %v41_v20  ;;  %v43_v23 = vld [vmem:[%s452_s1 + $0x70] sm:$0xff]  ;;  %v44_v24 = vld [vmem:[%s452_s1 + $0x78] sm:$0xff]  ;;  %v46_v26 = vld [vmem:[%s451_s0] sm:$0xff] }
   0xa   :  { %v312_v25 = vpack.c.bf16 %v44_v24, %v43_v23  ;;  %v132_v27 = vld [vmem:[%s454_s3] sm:$0xff]  ;;  %s345_s3 = smov [#allocation3]  }
   0xb   :  { %286 = vmatpush3.msra.mxu1 %v132_v27  ;;  %v45_v28 = vld [vmem:[#allocation2] sm:$0xff]  ;;  %s220_s6 = sshll.u32 %s345_s3, 4  ;;  %s221_s6 = int_to_ptr.vmem [resolvable:$true] %s220_s6 }
   0xc   :  { %298 = vmatpush3.bf16.msra.mxu0 %v297_v10  ;;  %v228_v32 = vld [vmem:[%s453_s2] ss:$0 sm:$0xff]  ;;  %s318_s7 = scalar_lea.vmem %s221_s6, 128  ;;  %p323_p1 = scmp.lt.s32.totalorder %s221_s6, %s221_s6 }
   0xd   :  { %299 = vmatprep.subr.bf16.mxu0 %v342_v3  ;;  %v229_v35 = vld [vmem:[%s455_s4] ss:$0 sm:$0xff]  ;;  %p319_p0 = scmp.ne.s32.totalorder %s221_s6, %s318_s7  ;;  %p324_p2 = scmp.lt.s32.totalorder %s318_s7, %s318_s7 }
   0xf   :  { %p325_p3 = por %p324_p2, %p323_p1 }
  0x10   :  { %301 = vmatpush3.bf16.msra.mxu0 %v300_v13 }
  0x11   :  { %302 = vmatprep.subr.bf16.mxu0 %v342_v3  ;;  %p326_p4 = pnand %p325_p3, %p319_p0 }
  0x14   :  { %304 = vmatpush3.bf16.msra.mxu0 %v303_v16 }
  0x15   :  { %305 = vmatprep.subr.bf16.mxu0 %v342_v3 }
  0x18   :  { %307 = vmatpush3.bf16.msra.mxu0 %v306_v19 }
  0x19   :  { %308 = vmatprep.subr.bf16.mxu0 %v342_v3 }
  0x1c   :  { %310 = vmatpush3.bf16.msra.mxu0 %v309_v22 }
  0x1d   :  { %311 = vmatprep.subr.bf16.mxu0 %v342_v3 }
  0x20   :  { %313 = vmatpush3.bf16.msra.mxu0 %v312_v25 }
  0x23   :  { %283 = vmatmul.mubr.f32.vlgmr.msra.gmra.mrb[0].mxu0 %v46_v26 }
  0xf6   :  { %v113_v29 = vpop.f32.mrb[0].mxu0 }
  0xf7   :  { %v117_v30 = vadd.f32 %v113_v29, %v45_v28  ;;  %v284_v31 = vpop.f32.mrb[1].mxu0 }
  0xf9   :  { %119 = vst.msk [vmem:[#allocation2] sm:$0xff] %vm25_vm1, %v117_v30 }
 0x100   :  { %v123_v33 = vld [vmem:[#allocation2] sm:$0xff] }
 0x101   :  { %v131_v34 = vmul.f32 %v228_v32, %v123_v33 }
 0x103   :  { %288 = vmatmul.mubr.msk.f32.vlgmr.msra.gmra.mrb[0].mxu1 %vm25_vm1, %v131_v34 }
 0x1d6   :  { %v209_v36 = vpop.f32.mrb[0].mxu1 }
 0x1d7   :  { %v210_v37 = vadd.f32 %v229_v35, %v209_v36  ;;  %v289_v38 = vpop.f32.mrb[1].mxu1 }
 0x1d9   :  { %213 = vst [vmem:[#allocation3] sm:$0xff] %v210_v37 }
 0x1da   :  { %329 = shalt.err (!%p326_p4)
}
 0x1db   :  { %s330_s9 = scalar_lea.hbm %s456_s5, 128 }
 0x1dc   :  { %p331_p5 = scmp.ne.s32.totalorder %s456_s5, %s330_s9  ;;  %p334_p6 = scmp.lt.u32.totalorder %s330_s9, %s456_s5 }
 0x1de   :  { %p336_p7 = pnand %p334_p6, %p331_p5 }
 0x1e0   :  { %339 = shalt.err (!%p336_p7)
}
 0x1e1   :  { %223 = dma.vmem_to_hbm [thread:$0]  %s221_s6, 128, %s456_s5, [#allocation4]  }
 0x1e2   :  { %340 = dma.done.wait [#allocation4], 128  }
 0x1e3   :  { %341 = vsyncadd [#allocation4], 4294967168 }
 0x1e4   :  { %227 = vsyncpa [#allocation4], 1 }

</bundles_post_ra>
